<compile_context>
chip_gen: v7x
topology: tpu7x:2x2x1
jax: 0.10.0
libtpu: 0.0.40
codegen_flags: <defaults>
</compile_context>

<pallas_src>
import math
from functools import partial

import numpy as np
import jax
import jax.numpy as jnp
from jax.experimental import pallas as pl
from jax.experimental.pallas import tpu as pltpu

# ---- small, deterministic config (stands in for cfg.MODEL.ROI_RELATION_HEAD.*) ----
D_MODEL = 32   # CONTEXT_HIDDEN_DIM
NUM_HEAD = 2   # TRANSFORMER.NUM_HEAD
D_K = 16       # TRANSFORMER.KEY_DIM
D_V = 16       # TRANSFORMER.VAL_DIM
D_INNER = 64   # TRANSFORMER.INNER_DIM
LN_EPS = 1e-5
NEG_BIG = -1e30

# column offsets inside the packed attention weight block  [wq | wk | wv | wfc]
_OFF_Q = 0
_OFF_K = NUM_HEAD * D_K
_OFF_V = _OFF_K + NUM_HEAD * D_K
_OFF_FC = _OFF_V + NUM_HEAD * D_V


def _sa_encoder_kernel(x_ref,        # (R, D_MODEL)  flattened padded features
                       bias_ref,     # (R, R)        additive block-diag key mask
                       npm_ref,      # (R, 1)        non-pad (valid row) mask
                       wattn_ref,    # (D_MODEL, 4*D_MODEL)  packed [wq|wk|wv|wfc]
                       w1_ref,       # (D_MODEL, D_INNER)
                       w2_ref,       # (D_INNER, D_MODEL)
                       vecs_ref,     # (10, 64)      packed biases / LN params
                       out_ref):     # (R, D_MODEL)
    x = x_ref[...]
    bias = bias_ref[...]
    npm = npm_ref[...]
    wa = wattn_ref[...]

    # ---- packed small vectors (static slices of the ref are cheap) ----
    bq = vecs_ref[0:1, 0:NUM_HEAD * D_K]
    bk = vecs_ref[1:2, 0:NUM_HEAD * D_K]
    bv = vecs_ref[2:3, 0:NUM_HEAD * D_V]
    bfc = vecs_ref[3:4, 0:D_MODEL]
    ln1w = vecs_ref[4:5, 0:D_MODEL]
    ln1b = vecs_ref[5:6, 0:D_MODEL]
    b1 = vecs_ref[6:7, 0:D_INNER]
    b2 = vecs_ref[7:8, 0:D_MODEL]
    ln2w = vecs_ref[8:9, 0:D_MODEL]
    ln2b = vecs_ref[9:10, 0:D_MODEL]

    temp = 1.0 / math.sqrt(D_K)

    # ---- multi-head attention over the whole batch at once.
    # Head concat + output projection folded into per-head (p @ v) @ Wfc_h
    # accumulation (mathematically identical to concat-then-fc).
    acc = jnp.zeros((x.shape[0], D_MODEL), jnp.float32)
    for h in range(NUM_HEAD):                      # static unroll (NUM_HEAD == 2)
        wq_h = wa[:, _OFF_Q + h * D_K:_OFF_Q + (h + 1) * D_K]
        wk_h = wa[:, _OFF_K + h * D_K:_OFF_K + (h + 1) * D_K]
        wv_h = wa[:, _OFF_V + h * D_V:_OFF_V + (h + 1) * D_V]
        wfc_h = wa[h * D_V:(h + 1) * D_V, _OFF_FC:_OFF_FC + D_MODEL]

        q = jnp.dot(x, wq_h, preferred_element_type=jnp.float32) + bq[:, h * D_K:(h + 1) * D_K]
        k = jnp.dot(x, wk_h, preferred_element_type=jnp.float32) + bk[:, h * D_K:(h + 1) * D_K]
        v = jnp.dot(x, wv_h, preferred_element_type=jnp.float32) + bv[:, h * D_V:(h + 1) * D_V]

        # scores over all R rows; block-diagonal additive bias keeps images
        # separate and masks padded keys (finite -1e30 -> exp underflows to 0).
        s = jax.lax.dot_general(q, k, (((1,), (1,)), ((), ())),
                                preferred_element_type=jnp.float32) * temp + bias
        m = jnp.max(s, axis=-1, keepdims=True)
        e = jnp.exp(s - m)
        p = e * pl.reciprocal(jnp.sum(e, axis=-1, keepdims=True), approx=True)
        ah = jnp.dot(p, v, preferred_element_type=jnp.float32)          # (R, D_V)
        acc = acc + jnp.dot(ah, wfc_h, preferred_element_type=jnp.float32)

    # ---- output projection bias + residual + LayerNorm 1 ----
    o = acc + bfc + x
    mu = jnp.mean(o, axis=-1, keepdims=True)
    var = jnp.mean((o - mu) ** 2, axis=-1, keepdims=True)
    o = (o - mu) * jax.lax.rsqrt(var + LN_EPS) * ln1w + ln1b
    o = o * npm                                     # zero padded rows

    # ---- position-wise FFN (two 1x1 convs == two linears) + residual + LN 2 ----
    h1 = jnp.maximum(
        jnp.dot(o, w1_ref[...], preferred_element_type=jnp.float32) + b1, 0.0)
    h2 = jnp.dot(h1, w2_ref[...], preferred_element_type=jnp.float32) + b2
    f = h2 + o
    mu2 = jnp.mean(f, axis=-1, keepdims=True)
    var2 = jnp.mean((f - mu2) ** 2, axis=-1, keepdims=True)
    f = (f - mu2) * jax.lax.rsqrt(var2 + LN_EPS) * ln2w + ln2b

    out_ref[...] = f * npm                          # single whole-batch store


def make_params(key):
    ks = jax.random.split(key, 8)
    s = 0.1
    p = {
        "wq": s * jax.random.normal(ks[0], (D_MODEL, NUM_HEAD * D_K), jnp.float32),
        "bq": jnp.zeros((1, NUM_HEAD * D_K), jnp.float32),
        "wk": s * jax.random.normal(ks[1], (D_MODEL, NUM_HEAD * D_K), jnp.float32),
        "bk": jnp.zeros((1, NUM_HEAD * D_K), jnp.float32),
        "wv": s * jax.random.normal(ks[2], (D_MODEL, NUM_HEAD * D_V), jnp.float32),
        "bv": jnp.zeros((1, NUM_HEAD * D_V), jnp.float32),
        "wfc": s * jax.random.normal(ks[3], (NUM_HEAD * D_V, D_MODEL), jnp.float32),
        "bfc": jnp.zeros((1, D_MODEL), jnp.float32),
        "ln1w": jnp.ones((1, D_MODEL), jnp.float32),
        "ln1b": jnp.zeros((1, D_MODEL), jnp.float32),
        # FFN: Conv1d(d_model, d_inner, 1) and Conv1d(d_inner, d_model, 1)
        "w1": s * jax.random.normal(ks[4], (D_MODEL, D_INNER), jnp.float32),
        "b1": jnp.zeros((1, D_INNER), jnp.float32),
        "w2": s * jax.random.normal(ks[5], (D_INNER, D_MODEL), jnp.float32),
        "b2": jnp.zeros((1, D_MODEL), jnp.float32),
        "ln2w": jnp.ones((1, D_MODEL), jnp.float32),
        "ln2b": jnp.zeros((1, D_MODEL), jnp.float32),
    }
    return p


def _pack_params(params):
    """Pack weights into one lane-dense (32,128) block and 10 small vectors into (10,64)."""
    assert NUM_HEAD * D_V == D_MODEL  # required for the [wq|wk|wv|wfc] column pack
    w_attn = jnp.concatenate(
        [params["wq"], params["wk"], params["wv"], params["wfc"]], axis=1)

    def pad64(v):
        return jnp.pad(v, ((0, 0), (0, 64 - v.shape[1])))

    vec_order = ["bq", "bk", "bv", "bfc", "ln1w", "ln1b", "b1", "b2", "ln2w", "ln2b"]
    vecs = jnp.concatenate([pad64(params[k]) for k in vec_order], axis=0)
    return w_attn, params["w1"], params["w2"], vecs


@partial(jax.jit, static_argnums=(1,))
def self_attention_cell(x, num_objs, params):
    """x: (N_total, d_model) f32; num_objs: static tuple of per-image counts."""
    num_objs = tuple(int(n) for n in num_objs)
    bsz = len(num_objs)
    n_total = sum(num_objs)
    d_model = x.shape[1]
    pad_len = max(8, -(-max(num_objs) // 8) * 8)     # round pad_len up to sublane x8
    R = bsz * pad_len

    # ---- static (trace-time) index / mask construction from static num_objs ----
    offsets = np.cumsum([0] + list(num_objs[:-1]))
    pad_idx = np.full((bsz, pad_len), n_total, np.int32)    # sentinel -> zero row
    for i, n in enumerate(num_objs):
        pad_idx[i, :n] = offsets[i] + np.arange(n)
    valid = (np.arange(pad_len)[None, :] < np.asarray(num_objs)[:, None]).reshape(-1)
    seg = np.repeat(np.arange(bsz), pad_len)
    allowed = (seg[:, None] == seg[None, :]) & valid[None, :]
    attn_bias = np.where(allowed, 0.0, NEG_BIG).astype(np.float32)       # (R, R)
    npm = valid.astype(np.float32).reshape(R, 1)                         # (R, 1)
    valid_idx = np.concatenate(
        [i * pad_len + np.arange(n) for i, n in enumerate(num_objs)]).astype(np.int32)

    # pad_sequence(batch_first=True) equivalent: ONE gather (no per-image DUS chain).
    x_ext = jnp.concatenate([x, jnp.zeros((1, d_model), x.dtype)], axis=0)
    padded = jnp.take(x_ext, jnp.asarray(pad_idx.reshape(-1)), axis=0)   # (R, d_model)

    w_attn, w1, w2, vecs = _pack_params(params)

    vmem = pl.BlockSpec(memory_space=pltpu.MemorySpace.VMEM)
    out_flat = pl.pallas_call(
        _sa_encoder_kernel,
        out_shape=jax.ShapeDtypeStruct((R, d_model), jnp.float32),
        in_specs=[vmem] * 7,
        out_specs=vmem,
    )(padded, jnp.asarray(attn_bias), jnp.asarray(npm), w_attn, w1, w2, vecs)

    # gather valid rows back to (N_total, d_model)  == enc_output[non_pad_mask]
    return jnp.take(out_flat, jnp.asarray(valid_idx), axis=0)


if __name__ == "__main__":
    key = jax.random.PRNGKey(0)
    k_params, k_x = jax.random.split(key)

    num_objs = (6, 3, 8)                 # per-image object counts (static)
    n_total = sum(num_objs)
    x = jax.random.normal(k_x, (n_total, D_MODEL), jnp.float32)

    params = make_params(k_params)
    out = self_attention_cell(x, num_objs, params)
    out = jax.block_until_ready(out)

    assert out.shape == (n_total, D_MODEL)
    assert bool(jnp.all(jnp.isfinite(out)))
    print("KERNEL_OK")
</pallas_src>

<mosaic_0001>
module attributes {stable_mosaic.version = 11 : i64} {
  func.func @_sa_encoder_kernel(%arg0: memref<24x32xf32, #tpu.memory_space<vmem>>, %arg1: memref<24x24xf32, #tpu.memory_space<vmem>>, %arg2: memref<24x1xf32, #tpu.memory_space<vmem>>, %arg3: memref<32x128xf32, #tpu.memory_space<vmem>>, %arg4: memref<32x64xf32, #tpu.memory_space<vmem>>, %arg5: memref<64x32xf32, #tpu.memory_space<vmem>>, %arg6: memref<10x64xf32, #tpu.memory_space<vmem>>, %arg7: memref<24x32xf32, #tpu.memory_space<vmem>>) attributes {dimension_semantics = [], scalar_prefetch = 0 : i64, scratch_operands = 0 : i64, tpu.core_type = #tpu.core_type<tc>} {
    %c0 = arith.constant 0 : index
    %c0_0 = arith.constant 0 : index
    %0 = vector.load %arg0[%c0, %c0_0] : memref<24x32xf32, #tpu.memory_space<vmem>>, vector<24x32xf32>
    %c0_1 = arith.constant 0 : index
    %c0_2 = arith.constant 0 : index
    %1 = vector.load %arg1[%c0_1, %c0_2] : memref<24x24xf32, #tpu.memory_space<vmem>>, vector<24x24xf32>
    %c0_3 = arith.constant 0 : index
    %c0_4 = arith.constant 0 : index
    %2 = vector.load %arg2[%c0_3, %c0_4] : memref<24x1xf32, #tpu.memory_space<vmem>>, vector<24x1xf32>
    %c0_5 = arith.constant 0 : index
    %c0_6 = arith.constant 0 : index
    %3 = vector.load %arg3[%c0_5, %c0_6] : memref<32x128xf32, #tpu.memory_space<vmem>>, vector<32x128xf32>
    %c0_7 = arith.constant 0 : index
    %c0_8 = arith.constant 0 : index
    %4 = vector.load %arg6[%c0_7, %c0_8] : memref<10x64xf32, #tpu.memory_space<vmem>>, vector<1x32xf32>
    %c1 = arith.constant 1 : index
    %c0_9 = arith.constant 0 : index
    %5 = vector.load %arg6[%c1, %c0_9] : memref<10x64xf32, #tpu.memory_space<vmem>>, vector<1x32xf32>
    %c2 = arith.constant 2 : index
    %c0_10 = arith.constant 0 : index
    %6 = vector.load %arg6[%c2, %c0_10] : memref<10x64xf32, #tpu.memory_space<vmem>>, vector<1x32xf32>
    %c3 = arith.constant 3 : index
    %c0_11 = arith.constant 0 : index
    %7 = vector.load %arg6[%c3, %c0_11] : memref<10x64xf32, #tpu.memory_space<vmem>>, vector<1x32xf32>
    %c4 = arith.constant 4 : index
    %c0_12 = arith.constant 0 : index
    %8 = vector.load %arg6[%c4, %c0_12] : memref<10x64xf32, #tpu.memory_space<vmem>>, vector<1x32xf32>
    %c5 = arith.constant 5 : index
    %c0_13 = arith.constant 0 : index
    %9 = vector.load %arg6[%c5, %c0_13] : memref<10x64xf32, #tpu.memory_space<vmem>>, vector<1x32xf32>
    %c6 = arith.constant 6 : index
    %c0_14 = arith.constant 0 : index
    %10 = vector.load %arg6[%c6, %c0_14] : memref<10x64xf32, #tpu.memory_space<vmem>>, vector<1x64xf32>
    %c7 = arith.constant 7 : index
    %c0_15 = arith.constant 0 : index
    %11 = vector.load %arg6[%c7, %c0_15] : memref<10x64xf32, #tpu.memory_space<vmem>>, vector<1x32xf32>
    %c8 = arith.constant 8 : index
    %c0_16 = arith.constant 0 : index
    %12 = vector.load %arg6[%c8, %c0_16] : memref<10x64xf32, #tpu.memory_space<vmem>>, vector<1x32xf32>
    %c9 = arith.constant 9 : index
    %c0_17 = arith.constant 0 : index
    %13 = vector.load %arg6[%c9, %c0_17] : memref<10x64xf32, #tpu.memory_space<vmem>>, vector<1x32xf32>
    %cst = arith.constant 0.000000e+00 : f32
    %14 = vector.broadcast %cst : f32 to vector<24x32xf32>
    %15 = vector.extract_strided_slice %3 {offsets = [0, 0], sizes = [32, 16], strides = [1, 1]} : vector<32x128xf32> to vector<32x16xf32>
    %16 = vector.extract_strided_slice %3 {offsets = [0, 32], sizes = [32, 16], strides = [1, 1]} : vector<32x128xf32> to vector<32x16xf32>
    %17 = vector.extract_strided_slice %3 {offsets = [0, 64], sizes = [32, 16], strides = [1, 1]} : vector<32x128xf32> to vector<32x16xf32>
    %18 = vector.extract_strided_slice %3 {offsets = [0, 96], sizes = [16, 32], strides = [1, 1]} : vector<32x128xf32> to vector<16x32xf32>
    %cst_18 = arith.constant dense<0.000000e+00> : vector<24x16xf32>
    %19 = tpu.matmul %0, %15, %cst_18 {dimension_numbers = #tpu.dot_dimension_numbers<[1], [0], [0], [1], [0, 0, 1, 1], [], []>} : vector<24x32xf32>, vector<32x16xf32>, vector<24x16xf32> -> vector<24x16xf32>
    %20 = vector.extract_strided_slice %4 {offsets = [0, 0], sizes = [1, 16], strides = [1, 1]} : vector<1x32xf32> to vector<1x16xf32>
    %21 = vector.broadcast %20 : vector<1x16xf32> to vector<24x16xf32>
    %22 = arith.addf %19, %21 : vector<24x16xf32>
    %cst_19 = arith.constant dense<0.000000e+00> : vector<24x16xf32>
    %23 = tpu.matmul %0, %16, %cst_19 {dimension_numbers = #tpu.dot_dimension_numbers<[1], [0], [0], [1], [0, 0, 1, 1], [], []>} : vector<24x32xf32>, vector<32x16xf32>, vector<24x16xf32> -> vector<24x16xf32>
    %24 = vector.extract_strided_slice %5 {offsets = [0, 0], sizes = [1, 16], strides = [1, 1]} : vector<1x32xf32> to vector<1x16xf32>
    %25 = vector.broadcast %24 : vector<1x16xf32> to vector<24x16xf32>
    %26 = arith.addf %23, %25 : vector<24x16xf32>
    %cst_20 = arith.constant dense<0.000000e+00> : vector<24x16xf32>
    %27 = tpu.matmul %0, %17, %cst_20 {dimension_numbers = #tpu.dot_dimension_numbers<[1], [0], [0], [1], [0, 0, 1, 1], [], []>} : vector<24x32xf32>, vector<32x16xf32>, vector<24x16xf32> -> vector<24x16xf32>
    %28 = vector.extract_strided_slice %6 {offsets = [0, 0], sizes = [1, 16], strides = [1, 1]} : vector<1x32xf32> to vector<1x16xf32>
    %29 = vector.broadcast %28 : vector<1x16xf32> to vector<24x16xf32>
    %30 = arith.addf %27, %29 : vector<24x16xf32>
    %cst_21 = arith.constant dense<0.000000e+00> : vector<24x24xf32>
    %31 = tpu.matmul %22, %26, %cst_21 {dimension_numbers = #tpu.dot_dimension_numbers<[1], [1], [0], [0], [0, 0, 1, 0], [], []>} : vector<24x16xf32>, vector<24x16xf32>, vector<24x24xf32> -> vector<24x24xf32>
    %cst_22 = arith.constant 2.500000e-01 : f32
    %32 = vector.broadcast %cst_22 : f32 to vector<24x24xf32>
    %33 = arith.mulf %31, %32 : vector<24x24xf32>
    %34 = arith.addf %33, %1 : vector<24x24xf32>
    %cst_23 = arith.constant dense<0xFF800000> : vector<24xf32>
    %35 = vector.multi_reduction <maximumf>, %34, %cst_23 [1] : vector<24x24xf32> to vector<24xf32>
    %36 = vector.shape_cast %35 : vector<24xf32> to vector<24x1xf32>
    %37 = vector.broadcast %36 : vector<24x1xf32> to vector<24x24xf32>
    %38 = arith.subf %34, %37 : vector<24x24xf32>
    %39 = math.exp %38 : vector<24x24xf32>
    %cst_24 = arith.constant dense<0.000000e+00> : vector<24xf32>
    %40 = vector.multi_reduction <add>, %39, %cst_24 [1] : vector<24x24xf32> to vector<24xf32>
    %41 = vector.shape_cast %40 : vector<24xf32> to vector<24x1xf32>
    %42 = tpu.reciprocal %41 {approx = true} : vector<24x1xf32> -> vector<24x1xf32>
    %43 = vector.broadcast %42 : vector<24x1xf32> to vector<24x24xf32>
    %44 = arith.mulf %39, %43 : vector<24x24xf32>
    %cst_25 = arith.constant dense<0.000000e+00> : vector<24x16xf32>
    %45 = tpu.matmul %44, %30, %cst_25 {dimension_numbers = #tpu.dot_dimension_numbers<[1], [0], [0], [1], [0, 0, 1, 1], [], []>} : vector<24x24xf32>, vector<24x16xf32>, vector<24x16xf32> -> vector<24x16xf32>
    %cst_26 = arith.constant dense<0.000000e+00> : vector<24x32xf32>
    %46 = tpu.matmul %45, %18, %cst_26 {dimension_numbers = #tpu.dot_dimension_numbers<[1], [0], [0], [1], [0, 0, 1, 1], [], []>} : vector<24x16xf32>, vector<16x32xf32>, vector<24x32xf32> -> vector<24x32xf32>
    %47 = arith.addf %14, %46 : vector<24x32xf32>
    %48 = vector.extract_strided_slice %3 {offsets = [0, 16], sizes = [32, 16], strides = [1, 1]} : vector<32x128xf32> to vector<32x16xf32>
    %49 = vector.extract_strided_slice %3 {offsets = [0, 48], sizes = [32, 16], strides = [1, 1]} : vector<32x128xf32> to vector<32x16xf32>
    %50 = vector.extract_strided_slice %3 {offsets = [0, 80], sizes = [32, 16], strides = [1, 1]} : vector<32x128xf32> to vector<32x16xf32>
    %51 = vector.extract_strided_slice %3 {offsets = [16, 96], sizes = [16, 32], strides = [1, 1]} : vector<32x128xf32> to vector<16x32xf32>
    %cst_27 = arith.constant dense<0.000000e+00> : vector<24x16xf32>
    %52 = tpu.matmul %0, %48, %cst_27 {dimension_numbers = #tpu.dot_dimension_numbers<[1], [0], [0], [1], [0, 0, 1, 1], [], []>} : vector<24x32xf32>, vector<32x16xf32>, vector<24x16xf32> -> vector<24x16xf32>
    %53 = vector.extract_strided_slice %4 {offsets = [0, 16], sizes = [1, 16], strides = [1, 1]} : vector<1x32xf32> to vector<1x16xf32>
    %54 = vector.broadcast %53 : vector<1x16xf32> to vector<24x16xf32>
    %55 = arith.addf %52, %54 : vector<24x16xf32>
    %cst_28 = arith.constant dense<0.000000e+00> : vector<24x16xf32>
    %56 = tpu.matmul %0, %49, %cst_28 {dimension_numbers = #tpu.dot_dimension_numbers<[1], [0], [0], [1], [0, 0, 1, 1], [], []>} : vector<24x32xf32>, vector<32x16xf32>, vector<24x16xf32> -> vector<24x16xf32>
    %57 = vector.extract_strided_slice %5 {offsets = [0, 16], sizes = [1, 16], strides = [1, 1]} : vector<1x32xf32> to vector<1x16xf32>
    %58 = vector.broadcast %57 : vector<1x16xf32> to vector<24x16xf32>
    %59 = arith.addf %56, %58 : vector<24x16xf32>
    %cst_29 = arith.constant dense<0.000000e+00> : vector<24x16xf32>
    %60 = tpu.matmul %0, %50, %cst_29 {dimension_numbers = #tpu.dot_dimension_numbers<[1], [0], [0], [1], [0, 0, 1, 1], [], []>} : vector<24x32xf32>, vector<32x16xf32>, vector<24x16xf32> -> vector<24x16xf32>
    %61 = vector.extract_strided_slice %6 {offsets = [0, 16], sizes = [1, 16], strides = [1, 1]} : vector<1x32xf32> to vector<1x16xf32>
    %62 = vector.broadcast %61 : vector<1x16xf32> to vector<24x16xf32>
    %63 = arith.addf %60, %62 : vector<24x16xf32>
    %cst_30 = arith.constant dense<0.000000e+00> : vector<24x24xf32>
    %64 = tpu.matmul %55, %59, %cst_30 {dimension_numbers = #tpu.dot_dimension_numbers<[1], [1], [0], [0], [0, 0, 1, 0], [], []>} : vector<24x16xf32>, vector<24x16xf32>, vector<24x24xf32> -> vector<24x24xf32>
    %cst_31 = arith.constant 2.500000e-01 : f32
    %65 = vector.broadcast %cst_31 : f32 to vector<24x24xf32>
    %66 = arith.mulf %64, %65 : vector<24x24xf32>
    %67 = arith.addf %66, %1 : vector<24x24xf32>
    %cst_32 = arith.constant dense<0xFF800000> : vector<24xf32>
    %68 = vector.multi_reduction <maximumf>, %67, %cst_32 [1] : vector<24x24xf32> to vector<24xf32>
    %69 = vector.shape_cast %68 : vector<24xf32> to vector<24x1xf32>
    %70 = vector.broadcast %69 : vector<24x1xf32> to vector<24x24xf32>
    %71 = arith.subf %67, %70 : vector<24x24xf32>
    %72 = math.exp %71 : vector<24x24xf32>
    %cst_33 = arith.constant dense<0.000000e+00> : vector<24xf32>
    %73 = vector.multi_reduction <add>, %72, %cst_33 [1] : vector<24x24xf32> to vector<24xf32>
    %74 = vector.shape_cast %73 : vector<24xf32> to vector<24x1xf32>
    %75 = tpu.reciprocal %74 {approx = true} : vector<24x1xf32> -> vector<24x1xf32>
    %76 = vector.broadcast %75 : vector<24x1xf32> to vector<24x24xf32>
    %77 = arith.mulf %72, %76 : vector<24x24xf32>
    %cst_34 = arith.constant dense<0.000000e+00> : vector<24x16xf32>
    %78 = tpu.matmul %77, %63, %cst_34 {dimension_numbers = #tpu.dot_dimension_numbers<[1], [0], [0], [1], [0, 0, 1, 1], [], []>} : vector<24x24xf32>, vector<24x16xf32>, vector<24x16xf32> -> vector<24x16xf32>
    %cst_35 = arith.constant dense<0.000000e+00> : vector<24x32xf32>
    %79 = tpu.matmul %78, %51, %cst_35 {dimension_numbers = #tpu.dot_dimension_numbers<[1], [0], [0], [1], [0, 0, 1, 1], [], []>} : vector<24x16xf32>, vector<16x32xf32>, vector<24x32xf32> -> vector<24x32xf32>
    %80 = arith.addf %47, %79 : vector<24x32xf32>
    %81 = vector.broadcast %7 : vector<1x32xf32> to vector<24x32xf32>
    %82 = arith.addf %80, %81 : vector<24x32xf32>
    %83 = arith.addf %82, %0 : vector<24x32xf32>
    %cst_36 = arith.constant dense<0.000000e+00> : vector<24xf32>
    %84 = vector.multi_reduction <add>, %83, %cst_36 [1] : vector<24x32xf32> to vector<24xf32>
    %85 = vector.shape_cast %84 : vector<24xf32> to vector<24x1xf32>
    %cst_37 = arith.constant 3.200000e+01 : f32
    %86 = vector.broadcast %cst_37 : f32 to vector<24x1xf32>
    %87 = arith.divf %85, %86 : vector<24x1xf32>
    %88 = vector.broadcast %87 : vector<24x1xf32> to vector<24x32xf32>
    %89 = arith.subf %83, %88 : vector<24x32xf32>
    %90 = arith.mulf %89, %89 : vector<24x32xf32>
    %cst_38 = arith.constant dense<0.000000e+00> : vector<24xf32>
    %91 = vector.multi_reduction <add>, %90, %cst_38 [1] : vector<24x32xf32> to vector<24xf32>
    %92 = vector.shape_cast %91 : vector<24xf32> to vector<24x1xf32>
    %cst_39 = arith.constant 3.200000e+01 : f32
    %93 = vector.broadcast %cst_39 : f32 to vector<24x1xf32>
    %94 = arith.divf %92, %93 : vector<24x1xf32>
    %95 = vector.broadcast %87 : vector<24x1xf32> to vector<24x32xf32>
    %96 = arith.subf %83, %95 : vector<24x32xf32>
    %cst_40 = arith.constant 9.99999974E-6 : f32
    %97 = vector.broadcast %cst_40 : f32 to vector<24x1xf32>
    %98 = arith.addf %94, %97 : vector<24x1xf32>
    %99 = math.rsqrt %98 : vector<24x1xf32>
    %100 = vector.broadcast %99 : vector<24x1xf32> to vector<24x32xf32>
    %101 = arith.mulf %96, %100 : vector<24x32xf32>
    %102 = vector.broadcast %8 : vector<1x32xf32> to vector<24x32xf32>
    %103 = arith.mulf %101, %102 : vector<24x32xf32>
    %104 = vector.broadcast %9 : vector<1x32xf32> to vector<24x32xf32>
    %105 = arith.addf %103, %104 : vector<24x32xf32>
    %106 = vector.broadcast %2 : vector<24x1xf32> to vector<24x32xf32>
    %107 = arith.mulf %105, %106 : vector<24x32xf32>
    %c0_41 = arith.constant 0 : index
    %c0_42 = arith.constant 0 : index
    %108 = vector.load %arg4[%c0_41, %c0_42] : memref<32x64xf32, #tpu.memory_space<vmem>>, vector<32x64xf32>
    %cst_43 = arith.constant dense<0.000000e+00> : vector<24x64xf32>
    %109 = tpu.matmul %107, %108, %cst_43 {dimension_numbers = #tpu.dot_dimension_numbers<[1], [0], [0], [1], [0, 0, 1, 1], [], []>} : vector<24x32xf32>, vector<32x64xf32>, vector<24x64xf32> -> vector<24x64xf32>
    %110 = vector.broadcast %10 : vector<1x64xf32> to vector<24x64xf32>
    %111 = arith.addf %109, %110 : vector<24x64xf32>
    %cst_44 = arith.constant 0.000000e+00 : f32
    %112 = vector.broadcast %cst_44 : f32 to vector<24x64xf32>
    %113 = arith.maximumf %111, %112 : vector<24x64xf32>
    %c0_45 = arith.constant 0 : index
    %c0_46 = arith.constant 0 : index
    %114 = vector.load %arg5[%c0_45, %c0_46] : memref<64x32xf32, #tpu.memory_space<vmem>>, vector<64x32xf32>
    %cst_47 = arith.constant dense<0.000000e+00> : vector<24x32xf32>
    %115 = tpu.matmul %113, %114, %cst_47 {dimension_numbers = #tpu.dot_dimension_numbers<[1], [0], [0], [1], [0, 0, 1, 1], [], []>} : vector<24x64xf32>, vector<64x32xf32>, vector<24x32xf32> -> vector<24x32xf32>
    %116 = vector.broadcast %11 : vector<1x32xf32> to vector<24x32xf32>
    %117 = arith.addf %115, %116 : vector<24x32xf32>
    %118 = arith.addf %117, %107 : vector<24x32xf32>
    %cst_48 = arith.constant dense<0.000000e+00> : vector<24xf32>
    %119 = vector.multi_reduction <add>, %118, %cst_48 [1] : vector<24x32xf32> to vector<24xf32>
    %120 = vector.shape_cast %119 : vector<24xf32> to vector<24x1xf32>
    %cst_49 = arith.constant 3.200000e+01 : f32
    %121 = vector.broadcast %cst_49 : f32 to vector<24x1xf32>
    %122 = arith.divf %120, %121 : vector<24x1xf32>
    %123 = vector.broadcast %122 : vector<24x1xf32> to vector<24x32xf32>
    %124 = arith.subf %118, %123 : vector<24x32xf32>
    %125 = arith.mulf %124, %124 : vector<24x32xf32>
    %cst_50 = arith.constant dense<0.000000e+00> : vector<24xf32>
    %126 = vector.multi_reduction <add>, %125, %cst_50 [1] : vector<24x32xf32> to vector<24xf32>
    %127 = vector.shape_cast %126 : vector<24xf32> to vector<24x1xf32>
    %cst_51 = arith.constant 3.200000e+01 : f32
    %128 = vector.broadcast %cst_51 : f32 to vector<24x1xf32>
    %129 = arith.divf %127, %128 : vector<24x1xf32>
    %130 = vector.broadcast %122 : vector<24x1xf32> to vector<24x32xf32>
    %131 = arith.subf %118, %130 : vector<24x32xf32>
    %cst_52 = arith.constant 9.99999974E-6 : f32
    %132 = vector.broadcast %cst_52 : f32 to vector<24x1xf32>
    %133 = arith.addf %129, %132 : vector<24x1xf32>
    %134 = math.rsqrt %133 : vector<24x1xf32>
    %135 = vector.broadcast %134 : vector<24x1xf32> to vector<24x32xf32>
    %136 = arith.mulf %131, %135 : vector<24x32xf32>
    %137 = vector.broadcast %12 : vector<1x32xf32> to vector<24x32xf32>
    %138 = arith.mulf %136, %137 : vector<24x32xf32>
    %139 = vector.broadcast %13 : vector<1x32xf32> to vector<24x32xf32>
    %140 = arith.addf %138, %139 : vector<24x32xf32>
    %141 = vector.broadcast %2 : vector<24x1xf32> to vector<24x32xf32>
    %142 = arith.mulf %140, %141 : vector<24x32xf32>
    %c0_53 = arith.constant 0 : index
    %c0_54 = arith.constant 0 : index
    %143 = vector.load %arg7[%c0_53, %c0_54] : memref<24x32xf32, #tpu.memory_space<vmem>>, vector<24x32xf32>
    tpu.vector_store %arg7[%c0_53, %c0_54], %142 {strides = array<i32>} : memref<24x32xf32, #tpu.memory_space<vmem>>, vector<24x32xf32>,
    return
  }
}

</mosaic_0001>

<bundles_post_ra>
// kernel: self_attention_cell.1
= control target key start
LH: loop header
LB: loop body
LE: loop exit
PB: predicated region body
PF: predicated region fallthrough
CT: control target
= control target key end

     0   :  { %v2185_v3 = vmov 0.0|0.0   ;;  %vm2186_vm0 = vmmov 0   ;;  %v2187_v4 = vmov 0.0   ;;  %s2188_s9 = smov 96   ;;  %vm53_vm1 = vcmask 261120   ;;  %s2190_s26 = smov 80   ;;  %s2638_s3 = inlined_call_operand.vmem [shape: f32[32,128], index: 3, kind: input, shape index: {}]   ;;  %s2639_s0 = inlined_call_operand.vmem [shape: f32[24,32], index: 0, kind: input, shape index: {}]   ;;  %s2640_s6 = inlined_call_operand.vmem [shape: f32[10,64], index: 6, kind: input, shape index: {}]   ;;  %s2641_s1 = inlined_call_operand.vmem [shape: f32[24,24], index: 1, kind: input, shape index: {}]   ;;  %s2642_s2 = inlined_call_operand.vmem [shape: f32[24,1], index: 2, kind: input, shape index: {}]   ;;  %s2643_s4 = inlined_call_operand.vmem [shape: f32[32,64], index: 4, kind: input, shape index: {}]   ;;  %s2644_s5 = inlined_call_operand.vmem [shape: f32[64,32], index: 5, kind: input, shape index: {}]   ;;  %s2645_s7 = inlined_call_operand.vmem [shape: f32[24,32], index: 7, kind: output, shape index: {}]  }
   0x1   :  { %v35_v0 = vld [vmem:[%s2638_s3] sm:$0xff]  ;;  %v36_v1 = vld [vmem:[%s2638_s3 + $0x8] sm:$0xff]  ;;  %v37_v2 = vld [vmem:[%s2638_s3 + $0x10] sm:$0xff]  ;;  %2009 = vmatprep.subr.bf16.mxu1 %v2185_v3  ;;  %1798 = vmatprep.mubr.msk.f32.mxu1 %vm2186_vm0, %v2187_v4  ;;  %vm339_vm2 = vcmask 130048   ;;  %vm444_vm4 = vcmask 195584   ;;  %s2191_s27 = smov 112  }
   0x2   :  { %v2247_v5 = vpack.i.bf16 %v36_v1, %v35_v0  ;;  %v38_v6 = vld [vmem:[%s2638_s3 + $0x18] sm:$0xff]  ;;  %2003 = vmatprep.subr.bf16.mxu0 %v2185_v3  ;;  %1781 = vmatprep.mubr.msk.f32.mxu0 %vm2186_vm0, %v2187_v4  ;;  %v2004_v8 = vpack.c.bf16 %v36_v1, %v35_v0  ;;  %v2264_v10 = vld [vmem:[%s2639_s0] sm:$0xff]  ;;  %v2273_v11 = vld [vmem:[%s2639_s0 + $0x8] sm:$0xff]  ;;  %s2192_s28 = smov 48   ;;  %s2193_s29 = smov 32   ;;  %vm1465_vm5 = vcmask 523264  }
   0x3   :  { %v2256_v7 = vpack.i.bf16 %v38_v6, %v37_v2  ;;  %v2007_v9 = vpack.c.bf16 %v38_v6, %v37_v2  ;;  %v2282_v12 = vld [vmem:[%s2639_s0 + $0x10] sm:$0xff]  ;;  %s2189_s0 = smov 64   ;;  %v2307_v29 = vld [vmem:[%s2640_s6 + $0x1] ss:$0 sm:$0xff]  ;;  %vm2313_vm3 = vmpackc.low %vm339_vm2, %vm339_vm2 }
   0x4   :  { %2088 = vrot.lane.b32.xlu0 %v2247_v5, %s2188_s9  ;;  %2005 = vmatpush3.bf16.msra.mxu0 %v2004_v8  ;;  %v2324_v39 = vld [vmem:[%s2640_s6] ss:$0 sm:$0xff]  ;;  %v2363_v57 = vld [vmem:[%s2641_s1 + $0x8] sm:$0xff]  ;;  %v2370_v63 = vld [vmem:[%s2641_s1 + $0x10] sm:$0xff] }
   0x5   :  { %2006 = vmatprep.subr.bf16.mxu0 %v2185_v3  ;;  %2098 = vrot.lane.b32.xlu1 %v2247_v5, %s2189_s0  ;;  %v2357_v52 = vld [vmem:[%s2641_s1] sm:$0xff] }
   0x8   :  { %2093 = vrot.lane.b32.xlu0 %v2256_v7, %s2188_s9  ;;  %2008 = vmatpush3.bf16.msra.mxu0 %v2007_v9 }
   0x9   :  { %2015 = vmatprep.subr.bf16.mxu0 %v2185_v3  ;;  %2103 = vrot.lane.b32.xlu1 %v2256_v7, %s2189_s0 }
   0xb   :  { %1782 = vmatmul.mubr.msk.f32.vlgmr.msra.gmra.mrb[0].mxu0 %vm53_vm1, %v2264_v10 }
   0xc   :  { %1784 = vmatprep.mubr.msk.f32.mxu0 %vm2186_vm0, %v2187_v4 }
   0xf   :  { %1785 = vmatmul.mubr.msk.f32.gmra.mrb[2].mxu0 %vm53_vm1, %v2273_v11 }
  0x10   :  { %1787 = vmatprep.mubr.msk.f32.mxu0 %vm2186_vm0, %v2187_v4 }
  0x13   :  { %1788 = vmatmul.mubr.msk.f32.gmra.mrb[4].mxu0 %vm53_vm1, %v2282_v12 }
  0x14   :  { %1815 = vmatprep.mubr.msk.f32.mxu0 %vm2186_vm0, %v2187_v4 }
  0x76   :  { %v2089_v13 = vpop.permute.xlu0 %2088 }
  0x77   :  { %v2091_v14 = vunpack.i.h.bf16 %v2089_v13  ;;  %v2090_v15 = vunpack.i.l.bf16 %v2089_v13  ;;  %v2099_v43 = vpop.permute.xlu1 %2098 }
  0x78   :  { %v2101_v44 = vunpack.i.h.bf16 %v2099_v43  ;;  %v2100_v45 = vunpack.i.l.bf16 %v2099_v43 }
  0x79   :  { %v2010_v16 = vpack.c.bf16 %v2091_v14, %v2090_v15 }
  0x7a   :  { %v2094_v17 = vpop.permute.xlu0 %2093  ;;  %v2016_v46 = vpack.c.bf16 %v2101_v44, %v2100_v45 }
  0x7b   :  { %v2096_v18 = vunpack.i.h.bf16 %v2094_v17  ;;  %v2095_v19 = vunpack.i.l.bf16 %v2094_v17  ;;  %2011 = vmatpush3.bf16.msra.mxu1 %v2010_v16  ;;  %v2104_v47 = vpop.permute.xlu1 %2103 }
  0x7c   :  { %2012 = vmatprep.subr.bf16.mxu1 %v2185_v3  ;;  %v2106_v48 = vunpack.i.h.bf16 %v2104_v47  ;;  %v2105_v49 = vunpack.i.l.bf16 %v2104_v47  ;;  %2017 = vmatpush3.bf16.msra.mxu0 %v2016_v46 }
  0x7d   :  { %v2013_v20 = vpack.c.bf16 %v2096_v18, %v2095_v19  ;;  %2018 = vmatprep.subr.bf16.mxu0 %v2185_v3 }
  0x7e   :  { %v2019_v50 = vpack.c.bf16 %v2106_v48, %v2105_v49 }
  0x7f   :  { %2014 = vmatpush3.bf16.msra.mxu1 %v2013_v20 }
  0x80   :  { %2021 = vmatprep.subr.bf16.mxu1 %v2185_v3  ;;  %2020 = vmatpush3.bf16.msra.mxu0 %v2019_v50 }
  0x81   :  { %2025 = vmatprep.subr.bf16.mxu0 %v2185_v3 }
  0x82   :  { %1799 = vmatmul.mubr.msk.f32.vlgmr.msra.gmra.mrb[0].mxu1 %vm53_vm1, %v2264_v10 }
  0x83   :  { %1801 = vmatprep.mubr.msk.f32.mxu1 %vm2186_vm0, %v2187_v4  ;;  %1816 = vmatmul.mubr.msk.f32.vlgmr.msra.gmra.mrb[6].mxu0 %vm53_vm1, %v2264_v10 }
  0x84   :  { %1818 = vmatprep.mubr.msk.f32.mxu0 %vm2186_vm0, %v2187_v4 }
  0x86   :  { %1802 = vmatmul.mubr.msk.f32.gmra.mrb[2].mxu1 %vm53_vm1, %v2273_v11 }
  0x87   :  { %1804 = vmatprep.mubr.msk.f32.mxu1 %vm2186_vm0, %v2187_v4  ;;  %1819 = vmatmul.mubr.msk.f32.gmra.mrb[8].mxu0 %vm53_vm1, %v2273_v11 }
  0x88   :  { %1821 = vmatprep.mubr.msk.f32.mxu0 %vm2186_vm0, %v2187_v4 }
  0x8a   :  { %1805 = vmatmul.mubr.msk.f32.gmra.mrb[4].mxu1 %vm53_vm1, %v2282_v12 }
  0x8b   :  { %1830 = vmatprep.mubr.msk.f32.mxu1 %vm2186_vm0, %v2187_v4  ;;  %1822 = vmatmul.mubr.msk.f32.gmra.mrb[10].mxu0 %vm53_vm1, %v2282_v12 }
  0x8c   :  { %1845 = vmatprep.mubr.msk.f32.mxu0 %vm2186_vm0, %v2187_v4 }
  0xde   :  { %v129_v21 = vpop.f32.mrb[0].mxu0 }
  0xdf   :  { %v1783_v22 = vpop.f32.mrb[1].mxu0  ;;  %v130_v40 = vadd.f32 %v2324_v39, %v129_v21 }
  0xe2   :  { %v134_v23 = vpop.f32.mrb[2].mxu0 }
  0xe3   :  { %v1786_v24 = vpop.f32.mrb[3].mxu0  ;;  %v135_v41 = vadd.f32 %v2324_v39, %v134_v23 }
  0xe6   :  { %v139_v25 = vpop.f32.mrb[4].mxu0 }
  0xe7   :  { %v1789_v26 = vpop.f32.mrb[5].mxu0  ;;  %v140_v42 = vadd.f32 %v2324_v39, %v139_v25 }
 0x155   :  { %v229_v27 = vpop.f32.mrb[0].mxu1 }
 0x156   :  { %v1800_v28 = vpop.f32.mrb[1].mxu1  ;;  %v230_v31 = vadd.f32 %v2307_v29, %v229_v27  ;;  %v325_v9 = vpop.f32.mrb[6].mxu0 }
 0x157   :  { %v1817_v13 = vpop.f32.mrb[7].mxu0 }
 0x159   :  { %v234_v30 = vpop.f32.mrb[2].mxu1 }
 0x15a   :  { %v235_v32 = vadd.f32 %v2307_v29, %v234_v30  ;;  %v1803_v33 = vpop.f32.mrb[3].mxu1  ;;  %v2381_v30 = vld [vmem:[%s2640_s6 + $0x2] ss:$0 sm:$0xff] }
 0x15c   :  { %v2022_v35 = vpack.c.bf16 %v235_v32, %v230_v31  ;;  %v326_v31 = vadd.f32 %v2381_v30, %v325_v9  ;;  %v330_v32 = vpop.f32.mrb[8].mxu0 }
 0x15d   :  { %v239_v36 = vpop.f32.mrb[4].mxu1  ;;  %v331_v33 = vadd.f32 %v2381_v30, %v330_v32 }
 0x15e   :  { %2024 = vmatpush3.bf16.xpose.msk.msra.mxu1 %vm2313_vm3, %v2022_v35  ;;  %v1806_v37 = vpop.f32.mrb[5].mxu1  ;;  %v240_v38 = vadd.f32 %v2307_v29, %v239_v36  ;;  %v1820_v35 = vpop.f32.mrb[9].mxu0 }
 0x15f   :  { %1828 = vmatprep.subr.mxu1 %v2187_v4  ;;  %v2026_v36 = vpack.c.bf16 %v331_v33, %v326_v31  ;;  %v335_v37 = vpop.f32.mrb[10].mxu0 }
 0x161   :  { %2027 = vmatpush3.bf16.msra.mxu0 %v2026_v36 }
 0x162   :  { %1843 = vmatprep.subr.mxu0 %v2187_v4 }
 0x166   :  { %1829 = vmatpush3.xpose.msk.msra.mxu1 %vm339_vm2, %v240_v38  ;;  %v1823_v38 = vpop.f32.mrb[11].mxu0 }
 0x167   :  { %2028 = vmatprep.subr.bf16.mxu1 %v2185_v3 }
 0x169   :  { %1831 = vmatmul.mubr.msk.f32.vlgmr.msra.gmra.mrb[6].mxu1 %vm339_vm2, %v130_v40  ;;  %v336_v40 = vadd.f32 %v2381_v30, %v335_v37 }
 0x16a   :  { %1833 = vmatprep.mubr.msk.f32.mxu1 %vm2186_vm0, %v2187_v4 }
 0x16b   :  { %1844 = vmatpush3.msra.mxu0 %v336_v40 }
 0x16c   :  { %2034 = vmatprep.subr.bf16.mxu0 %v2185_v3 }
 0x16d   :  { %1834 = vmatmul.mubr.msk.f32.gmra.mrb[8].mxu1 %vm339_vm2, %v135_v41 }
 0x16e   :  { %1836 = vmatprep.mubr.msk.f32.mxu1 %vm2186_vm0, %v2187_v4 }
 0x171   :  { %1837 = vmatmul.mubr.msk.f32.gmra.mrb[10].mxu1 %vm339_vm2, %v140_v42 }
 0x172   :  { %1862 = vmatprep.mubr.msk.f32.mxu1 %vm2186_vm0, %v2187_v4 }
 0x23c   :  { %v424_v51 = vpop.f32.mrb[6].mxu1 }
 0x23d   :  { %v438_v53 = vmul.f32 0.25, %v424_v51  ;;  %v1832_v54 = vpop.f32.mrb[7].mxu1 }
 0x23f   :  { %v441_v55 = vadd.f32 %v438_v53, %v2357_v52 }
 0x240   :  { %v429_v56 = vpop.f32.mrb[8].mxu1 }
 0x241   :  { %v439_v58 = vmul.f32 0.25, %v429_v56  ;;  %v1835_v59 = vpop.f32.mrb[9].mxu1  ;;  %v445_v60 = vsel %vm444_vm4, %v441_v55, -inf }
 0x242   :  { %446 = vmax.xlane.f32.xlu0 %v445_v60 }
 0x243   :  { %v442_v61 = vadd.f32 %v439_v58, %v2363_v57 }
 0x244   :  { %v434_v62 = vpop.f32.mrb[10].mxu1 }
 0x245   :  { %v440_v0 = vmul.f32 0.25, %v434_v62  ;;  %v1838_v1 = vpop.f32.mrb[11].mxu1  ;;  %v448_v2 = vsel %vm444_vm4, %v442_v61, -inf }
 0x246   :  { %449 = vmax.xlane.f32.xlu1 %v448_v2 }
 0x247   :  { %v443_v6 = vadd.f32 %v440_v0, %v2370_v63 }
 0x249   :  { %v451_v8 = vsel %vm444_vm4, %v443_v6, -inf }
 0x24a   :  { %452 = vmax.xlane.f32.xlu0 %v451_v8 }
 0x2cf   :  { %v447_v14 = vpop.xlane.xlu0 %446 }
 0x2d0   :  { %v454_v15 = vsub.f32 %v441_v55, %v447_v14 }
 0x2d2   :  { %v457_v16 = vmul.f32 1.442695, %v454_v15 }
 0x2d3   :  { %v450_v17 = vpop.xlane.xlu1 %449 }
 0x2d4   :  { %2149 = vpow2.f32 %v457_v16  ;;  %v455_v18 = vsub.f32 %v442_v61, %v450_v17 }
 0x2d6   :  { %v459_v19 = vmul.f32 1.442695, %v455_v18 }
 0x2d7   :  { %v453_v20 = vpop.xlane.xlu0 %452 }
 0x2d8   :  { %2151 = vpow2.f32 %v459_v19  ;;  %v456_v21 = vsub.f32 %v443_v6, %v453_v20 }
 0x2da   :  { %v461_v22 = vmul.f32 1.442695, %v456_v21 }
 0x2dc   :  { %2153 = vpow2.f32 %v461_v22 }
 0x2de   :  { %v2150_v23 = vpop.eup %2149 }
 0x2df   :  { %v463_v24 = vsel %vm444_vm4, %v2150_v23, 0.0 }
 0x2e0   :  { %464 = vadd.xlane.f32.xlu0 %v463_v24 }
 0x2e2   :  { %v2152_v25 = vpop.eup %2151 }
 0x2e3   :  { %v466_v26 = vsel %vm444_vm4, %v2152_v25, 0.0 }
 0x2e4   :  { %467 = vadd.xlane.f32.xlu1 %v466_v26 }
 0x2e6   :  { %v2154_v27 = vpop.eup %2153 }
 0x2e7   :  { %v469_v28 = vsel %vm444_vm4, %v2154_v27, 0.0 }
 0x2e8   :  { %470 = vadd.xlane.f32.xlu0 %v469_v28 }
 0x2f5   :  { %2108 = vrot.lane.b32.xlu1 %v2247_v5, %s2190_s26 }
 0x2f9   :  { %2118 = vrot.lane.b32.xlu1 %v2247_v5, %s2191_s27 }
 0x2fd   :  { %2123 = vrot.lane.b32.xlu1 %v2256_v7, %s2191_s27 }
 0x2fe   :  { %2113 = vrot.lane.b32.xlu0 %v2256_v7, %s2190_s26 }
 0x301   :  { %580 = vrot.lane.b32.xlu1 %v2324_v39, %s2191_s27 }
 0x302   :  { %676 = vrot.lane.b32.xlu0 %v2307_v29, %s2191_s27 }
 0x305   :  { %2133 = vrot.lane.b32.xlu1 %v2256_v7, %s2192_s28 }
 0x306   :  { %2128 = vrot.lane.b32.xlu0 %v2247_v5, %s2192_s28 }
 0x36d   :  { %v465_v41 = vpop.xlane.xlu0 %464 }
 0x36e   :  { %2155 = vrcp.f32 %v465_v41 }
 0x371   :  { %v468_v42 = vpop.xlane.xlu1 %467 }
 0x372   :  { %2157 = vrcp.f32 %v468_v42 }
 0x375   :  { %v471_v43 = vpop.xlane.xlu0 %470  ;;  %v2109_v44 = vpop.permute.xlu1 %2108 }
 0x376   :  { %2159 = vrcp.f32 %v471_v43  ;;  %v2111_v45 = vunpack.i.h.bf16 %v2109_v44  ;;  %v2110_v46 = vunpack.i.l.bf16 %v2109_v44 }
 0x378   :  { %v2156_v47 = vpop.eup %2155  ;;  %v2035_v48 = vpack.c.bf16 %v2111_v45, %v2110_v46 }
 0x379   :  { %v475_v49 = vmul.f32 %v2156_v47, %v2150_v23  ;;  %v2114_v50 = vpop.permute.xlu0 %2113  ;;  %v2119_v51 = vpop.permute.xlu1 %2118 }
 0x37a   :  { %v2116_v53 = vunpack.i.h.bf16 %v2114_v50  ;;  %v2115_v54 = vunpack.i.l.bf16 %v2114_v50  ;;  %v2121_v39 = vunpack.i.h.bf16 %v2119_v51  ;;  %v2120_v55 = vunpack.i.l.bf16 %v2119_v51 }
 0x37b   :  { %1846 = vmatmul.mubr.msk.f32.vlgmr.msra.gmra.mrb[12].mxu0 %vm444_vm4, %v475_v49 }
 0x37c   :  { %v2158_v29 = vpop.eup %2157  ;;  %1848 = vmatprep.mubr.msk.f32.mxu0 %vm2186_vm0, %v2187_v4  ;;  %v2038_v56 = vpack.c.bf16 %v2116_v53, %v2115_v54  ;;  %2036 = vmatpush3.bf16.msra.mxu0 %v2035_v48  ;;  %v2029_v58 = vpack.c.bf16 %v2121_v39, %v2120_v55 }
 0x37d   :  { %v476_v59 = vmul.f32 %v2158_v29, %v2152_v25  ;;  %2037 = vmatprep.subr.bf16.mxu0 %v2185_v3  ;;  %v2124_v60 = vpop.permute.xlu1 %2123  ;;  %v677_v20 = vpop.permute.xlu0 %676 }
 0x37e   :  { %v2126_v61 = vunpack.i.h.bf16 %v2124_v60  ;;  %v2125_v62 = vunpack.i.l.bf16 %v2124_v60  ;;  %2030 = vmatpush3.bf16.msra.mxu1 %v2029_v58 }
 0x37f   :  { %1849 = vmatmul.mubr.msk.f32.gmra.mrb[14].mxu0 %vm444_vm4, %v476_v59  ;;  %2031 = vmatprep.subr.bf16.mxu1 %v2185_v3 }
 0x380   :  { %v2160_v0 = vpop.eup %2159  ;;  %1851 = vmatprep.mubr.msk.f32.mxu0 %vm2186_vm0, %v2187_v4  ;;  %2039 = vmatpush3.bf16.msra.mxu0 %v2038_v56  ;;  %v2032_v1 = vpack.c.bf16 %v2126_v61, %v2125_v62 }
 0x381   :  { %v477_v2 = vmul.f32 %v2160_v0, %v2154_v27  ;;  %2046 = vmatprep.subr.bf16.mxu0 %v2185_v3  ;;  %v581_v35 = vpop.permute.xlu1 %580  ;;  %v2129_v40 = vpop.permute.xlu0 %2128 }
 0x382   :  { %2033 = vmatpush3.bf16.msra.mxu1 %v2032_v1  ;;  %v2131_v42 = vunpack.i.h.bf16 %v2129_v40  ;;  %v2130_v43 = vunpack.i.l.bf16 %v2129_v40 }
 0x383   :  { %1852 = vmatmul.mubr.msk.f32.gmra.mrb[16].mxu0 %vm444_vm4, %v477_v2  ;;  %2040 = vmatprep.subr.bf16.mxu1 %v2185_v3 }
 0x384   :  { %1879 = vmatprep.mubr.msk.f32.mxu0 %vm2186_vm0, %v2187_v4  ;;  %v2041_v46 = vpack.c.bf16 %v2131_v42, %v2130_v43 }
 0x385   :  { %1863 = vmatmul.mubr.msk.f32.vlgmr.msra.gmra.mrb[12].mxu1 %vm53_vm1, %v2264_v10  ;;  %v2134_v41 = vpop.permute.xlu1 %2133 }
 0x386   :  { %1865 = vmatprep.mubr.msk.f32.mxu1 %vm2186_vm0, %v2187_v4  ;;  %v2136_v44 = vunpack.i.h.bf16 %v2134_v41  ;;  %v2135_v45 = vunpack.i.l.bf16 %v2134_v41  ;;  %2042 = vmatpush3.bf16.msra.mxu1 %v2041_v46 }
 0x387   :  { %1880 = vmatmul.mubr.msk.f32.vlgmr.msra.gmra.mrb[18].mxu0 %vm53_vm1, %v2264_v10  ;;  %2043 = vmatprep.subr.bf16.mxu1 %v2185_v3 }
 0x388   :  { %1882 = vmatprep.mubr.msk.f32.mxu0 %vm2186_vm0, %v2187_v4  ;;  %v2044_v47 = vpack.c.bf16 %v2136_v44, %v2135_v45 }
 0x389   :  { %1866 = vmatmul.mubr.msk.f32.gmra.mrb[14].mxu1 %vm53_vm1, %v2273_v11 }
 0x38a   :  { %1868 = vmatprep.mubr.msk.f32.mxu1 %vm2186_vm0, %v2187_v4  ;;  %2045 = vmatpush3.bf16.msra.mxu1 %v2044_v47 }
 0x38b   :  { %1883 = vmatmul.mubr.msk.f32.gmra.mrb[20].mxu0 %vm53_vm1, %v2273_v11  ;;  %2050 = vmatprep.subr.bf16.mxu1 %v2185_v3 }
 0x38c   :  { %1885 = vmatprep.mubr.msk.f32.mxu0 %vm2186_vm0, %v2187_v4 }
 0x38d   :  { %1869 = vmatmul.mubr.msk.f32.gmra.mrb[16].mxu1 %vm53_vm1, %v2282_v12 }
 0x38e   :  { %1896 = vmatprep.mubr.msk.f32.mxu1 %vm2186_vm0, %v2187_v4 }
 0x38f   :  { %1886 = vmatmul.mubr.msk.f32.gmra.mrb[22].mxu0 %vm53_vm1, %v2282_v12 }
 0x390   :  { %1911 = vmatprep.mubr.msk.f32.mxu0 %vm2186_vm0, %v2187_v4 }
 0x391   :  { %1897 = vmatmul.mubr.msk.f32.vlgmr.msra.gmra.mrb[18].mxu1 %vm53_vm1, %v2264_v10 }
 0x392   :  { %1899 = vmatprep.mubr.msk.f32.mxu1 %vm2186_vm0, %v2187_v4 }
 0x395   :  { %1900 = vmatmul.mubr.msk.f32.gmra.mrb[20].mxu1 %vm53_vm1, %v2273_v11 }
 0x396   :  { %1902 = vmatprep.mubr.msk.f32.mxu1 %vm2186_vm0, %v2187_v4 }
 0x399   :  { %1903 = vmatmul.mubr.msk.f32.gmra.mrb[22].mxu1 %vm53_vm1, %v2282_v12 }
 0x39a   :  { %1926 = vmatprep.mubr.msk.f32.mxu1 %vm2186_vm0, %v2187_v4 }
 0x44e   :  { %v2437_v6 = vpop.f32.mrb[12].mxu0 }
 0x44f   :  { %v1847_v8 = vpop.f32.mrb[13].mxu0 }
 0x452   :  { %v2439_v9 = vpop.f32.mrb[14].mxu0 }
 0x453   :  { %v1850_v13 = vpop.f32.mrb[15].mxu0 }
 0x456   :  { %v2441_v14 = vpop.f32.mrb[16].mxu0 }
 0x457   :  { %v1853_v15 = vpop.f32.mrb[17].mxu0 }
 0x458   :  { %v649_v16 = vpop.f32.mrb[12].mxu1 }
 0x459   :  { %v1864_v17 = vpop.f32.mrb[13].mxu1  ;;  %v650_v37 = vadd.f32 %v649_v16, %v581_v35 }
 0x45a   :  { %v745_v18 = vpop.f32.mrb[18].mxu0 }
 0x45b   :  { %v1881_v19 = vpop.f32.mrb[19].mxu0  ;;  %v746_v24 = vadd.f32 %v745_v18, %v677_v20 }
 0x45c   :  { %v654_v21 = vpop.f32.mrb[14].mxu1 }
 0x45d   :  { %v1867_v22 = vpop.f32.mrb[15].mxu1  ;;  %v655_v38 = vadd.f32 %v654_v21, %v581_v35 }
 0x45e   :  { %v750_v23 = vpop.f32.mrb[20].mxu0 }
 0x45f   :  { %v751_v25 = vadd.f32 %v750_v23, %v677_v20  ;;  %v1884_v26 = vpop.f32.mrb[21].mxu0 }
 0x460   :  { %v659_v27 = vpop.f32.mrb[16].mxu1 }
 0x461   :  { %v2047_v28 = vpack.c.bf16 %v751_v25, %v746_v24  ;;  %v1870_v31 = vpop.f32.mrb[17].mxu1  ;;  %v660_v34 = vadd.f32 %v659_v27, %v581_v35 }
 0x462   :  { %v755_v32 = vpop.f32.mrb[22].mxu0 }
 0x463   :  { %2049 = vmatpush3.bf16.xpose.msk.msra.mxu0 %vm2313_vm3, %v2047_v28  ;;  %v1887_v33 = vpop.f32.mrb[23].mxu0  ;;  %v756_v36 = vadd.f32 %v755_v32, %v677_v20 }
 0x464   :  { %1909 = vmatprep.subr.mxu0 %v2187_v4  ;;  %v841_v22 = vpop.f32.mrb[18].mxu1 }
 0x465   :  { %v1898_v23 = vpop.f32.mrb[19].mxu1 }
 0x468   :  { %v846_v24 = vpop.f32.mrb[20].mxu1 }
 0x469   :  { %v1901_v25 = vpop.f32.mrb[21].mxu1 }
 0x46b   :  { %1910 = vmatpush3.xpose.msk.msra.mxu0 %vm339_vm2, %v756_v36 }
 0x46c   :  { %2053 = vmatprep.subr.bf16.mxu0 %v2185_v3  ;;  %v851_v26 = vpop.f32.mrb[22].mxu1 }
 0x46d   :  { %v1904_v27 = vpop.f32.mrb[23].mxu1 }
 0x46e   :  { %1912 = vmatmul.mubr.msk.f32.vlgmr.msra.gmra.mrb[24].mxu0 %vm339_vm2, %v650_v37 }
 0x46f   :  { %1914 = vmatprep.mubr.msk.f32.mxu0 %vm2186_vm0, %v2187_v4 }
 0x472   :  { %1915 = vmatmul.mubr.msk.f32.gmra.mrb[26].mxu0 %vm339_vm2, %v655_v38 }
 0x473   :  { %1917 = vmatprep.mubr.msk.f32.mxu0 %vm2186_vm0, %v2187_v4 }
 0x476   :  { %1918 = vmatmul.mubr.msk.f32.gmra.mrb[28].mxu0 %vm339_vm2, %v660_v34 }
 0x477   :  { %1939 = vmatprep.mubr.msk.f32.mxu0 %vm2186_vm0, %v2187_v4 }
 0x541   :  { %v939_v48 = vpop.f32.mrb[24].mxu0 }
 0x542   :  { %v953_v49 = vmul.f32 0.25, %v939_v48  ;;  %v1913_v50 = vpop.f32.mrb[25].mxu0 }
 0x544   :  { %v956_v51 = vadd.f32 %v953_v49, %v2357_v52 }
 0x545   :  { %v944_v53 = vpop.f32.mrb[26].mxu0 }
 0x546   :  { %v954_v54 = vmul.f32 0.25, %v944_v53  ;;  %v1916_v39 = vpop.f32.mrb[27].mxu0  ;;  %v959_v55 = vsel %vm444_vm4, %v956_v51, -inf }
 0x547   :  { %960 = vmax.xlane.f32.xlu0 %v959_v55 }
 0x548   :  { %v957_v29 = vadd.f32 %v954_v54, %v2363_v57 }
 0x549   :  { %v949_v56 = vpop.f32.mrb[28].mxu0 }
 0x54a   :  { %v955_v58 = vmul.f32 0.25, %v949_v56  ;;  %v1919_v59 = vpop.f32.mrb[29].mxu0  ;;  %v962_v60 = vsel %vm444_vm4, %v957_v29, -inf }
 0x54b   :  { %963 = vmax.xlane.f32.xlu1 %v962_v60  ;;  %v1666_v59 = vld [vmem:[%s2640_s6 + $0x3] ss:$0 sm:$0xff] }
 0x54c   :  { %v958_v61 = vadd.f32 %v955_v58, %v2370_v63 }
 0x54e   :  { %v965_v62 = vsel %vm444_vm4, %v958_v61, -inf }
 0x54f   :  { %966 = vmax.xlane.f32.xlu0 %v965_v62 }
 0x5d4   :  { %v961_v52 = vpop.xlane.xlu0 %960 }
 0x5d5   :  { %v968_v0 = vsub.f32 %v956_v51, %v961_v52 }
 0x5d7   :  { %v971_v1 = vmul.f32 1.442695, %v968_v0 }
 0x5d8   :  { %v964_v2 = vpop.xlane.xlu1 %963 }
 0x5d9   :  { %2161 = vpow2.f32 %v971_v1  ;;  %v969_v8 = vsub.f32 %v957_v29, %v964_v2 }
 0x5db   :  { %v973_v13 = vmul.f32 1.442695, %v969_v8 }
 0x5dc   :  { %v967_v15 = vpop.xlane.xlu0 %966 }
 0x5dd   :  { %2163 = vpow2.f32 %v973_v13  ;;  %v970_v57 = vsub.f32 %v958_v61, %v967_v15 }
 0x5df   :  { %v975_v16 = vmul.f32 1.442695, %v970_v57 }
 0x5e1   :  { %2165 = vpow2.f32 %v975_v16 }
 0x5e3   :  { %v2162_v17 = vpop.eup %2161 }
 0x5e4   :  { %v977_v18 = vsel %vm444_vm4, %v2162_v17, 0.0 }
 0x5e5   :  { %978 = vadd.xlane.f32.xlu0 %v977_v18 }
 0x5e7   :  { %v2164_v63 = vpop.eup %2163 }
 0x5e8   :  { %v980_v19 = vsel %vm444_vm4, %v2164_v63, 0.0 }
 0x5e9   :  { %981 = vadd.xlane.f32.xlu1 %v980_v19 }
 0x5eb   :  { %v2166_v20 = vpop.eup %2165 }
 0x5ec   :  { %v983_v21 = vsel %vm444_vm4, %v2166_v20, 0.0 }
 0x5ed   :  { %984 = vadd.xlane.f32.xlu0 %v983_v21 }
 0x5fa   :  { %772 = vrot.lane.b32.xlu1 %v2381_v30, %s2191_s27 }
 0x5fe   :  { %2143 = vrot.lane.b32.xlu1 %v2247_v5, %s2193_s29 }
 0x603   :  { %2138 = vrot.lane.b32.xlu0 %v2256_v7, %s2193_s29 }
 0x672   :  { %v979_v28 = vpop.xlane.xlu0 %978 }
 0x673   :  { %2167 = vrcp.f32 %v979_v28 }
 0x676   :  { %v982_v31 = vpop.xlane.xlu1 %981 }
 0x677   :  { %2169 = vrcp.f32 %v982_v31 }
 0x67a   :  { %v773_v32 = vpop.permute.xlu1 %772  ;;  %v985_v33 = vpop.xlane.xlu0 %984 }
 0x67b   :  { %v842_v35 = vadd.f32 %v841_v22, %v773_v32  ;;  %v847_v36 = vadd.f32 %v846_v24, %v773_v32  ;;  %2171 = vrcp.f32 %v985_v33  ;;  %v852_v5 = vadd.f32 %v851_v26, %v773_v32  ;;  %v32_v33 = vld [vmem:[%s2642_s2] sm:$0xff] }
 0x67c   :  { %v2194_v22 = vmov 0  }
 0x67d   :  { %v2051_v37 = vpack.c.bf16 %v847_v36, %v842_v35  ;;  %v2168_v34 = vpop.eup %2167  ;;  %2148 = vset.pattern.permute.xlu1 %v2194_v22  ;;  %2147 = vset.pattern.permute.xlu0 %v2194_v22  ;;  %v1353_v35 = vld [vmem:[%s2643_s4] sm:$0xff]  ;;  %v1354_v36 = vld [vmem:[%s2643_s4 + $0x8] sm:$0xff]  ;;  %v1459_v22 = vld [vmem:[%s2644_s5 + $0x30] sm:$0xff] }
 0x67e   :  { %v2144_v38 = vpop.permute.xlu1 %2143  ;;  %v989_v7 = vmul.f32 %v2168_v34, %v2162_v17  ;;  %v2139_v46 = vpop.permute.xlu0 %2138  ;;  %v1356_v34 = vld [vmem:[%s2643_s4 + $0x18] sm:$0xff] }
 0x67f   :  { %2052 = vmatpush3.bf16.msra.mxu1 %v2051_v37  ;;  %v2146_v30 = vunpack.i.h.bf16 %v2144_v38  ;;  %v2145_v40 = vunpack.i.l.bf16 %v2144_v38  ;;  %v2141_v47 = vunpack.i.h.bf16 %v2139_v46  ;;  %v2140_v48 = vunpack.i.l.bf16 %v2139_v46  ;;  %v1355_v38 = vld [vmem:[%s2643_s4 + $0x10] sm:$0xff] }
 0x680   :  { %1924 = vmatprep.subr.mxu1 %v2187_v4  ;;  %v2060_v37 = vpack.c.bf16 %v1354_v36, %v1353_v35  ;;  %v1455_v46 = vld [vmem:[%s2644_s5 + $0x10] sm:$0xff] }
 0x681   :  { %v2057_v41 = vpack.c.bf16 %v2146_v30, %v2145_v40  ;;  %v2170_v42 = vpop.eup %2169  ;;  %v2054_v49 = vpack.c.bf16 %v2141_v47, %v2140_v48  ;;  %v2063_v30 = vpack.c.bf16 %v1356_v34, %v1355_v38  ;;  %v1456_v48 = vld [vmem:[%s2644_s5 + $0x18] sm:$0xff]  ;;  %v1673_v38 = vld [vmem:[%s2640_s6 + $0x7] ss:$0 sm:$0xff] }
 0x682   :  { %v990_v43 = vmul.f32 %v2170_v42, %v2164_v63 }
 0x683   :  { %1925 = vmatpush3.msra.mxu1 %v852_v5  ;;  %2055 = vmatpush3.bf16.msra.mxu0 %v2054_v49  ;;  %v2069_v49 = vpack.c.bf16 %v1456_v48, %v1455_v46 }
 0x684   :  { %1927 = vmatmul.mubr.msk.f32.vlgmr.msra.gmra.mrb[24].mxu1 %vm444_vm4, %v989_v7  ;;  %2056 = vmatprep.subr.bf16.mxu1 %v2185_v3 }
 0x685   :  { %1929 = vmatprep.mubr.msk.f32.mxu1 %vm2186_vm0, %v2187_v4  ;;  %2058 = vmatpush3.bf16.msra.mxu1 %v2057_v41  ;;  %v2172_v44 = vpop.eup %2171 }
 0x686   :  { %2065 = vmatprep.subr.bf16.mxu1 %v2185_v3  ;;  %v991_v45 = vmul.f32 %v2172_v44, %v2166_v20  ;;  %2059 = vmatprep.subr.bf16.mxu0 %v2185_v3  ;;  %v1453_v44 = vld [vmem:[%s2644_s5] sm:$0xff] }
 0x688   :  { %1930 = vmatmul.mubr.msk.f32.gmra.mrb[26].mxu1 %vm444_vm4, %v990_v43  ;;  %v34_v43 = vld [vmem:[%s2642_s2 + $0x10] sm:$0xff] }
 0x689   :  { %1932 = vmatprep.mubr.msk.f32.mxu1 %vm2186_vm0, %v2187_v4 }
 0x68c   :  { %1933 = vmatmul.mubr.msk.f32.gmra.mrb[28].mxu1 %vm444_vm4, %v991_v45  ;;  %v1454_v45 = vld [vmem:[%s2644_s5 + $0x8] sm:$0xff] }
 0x68d   :  { %1952 = vmatprep.mubr.msk.f32.mxu1 %vm2186_vm0, %v2187_v4  ;;  %v2066_v47 = vpack.c.bf16 %v1454_v45, %v1453_v44 }
 0x690   :  { %1953 = vmatmul.mubr.msk.f32.vlgmr.msra.gmra.mrb[30].mxu1 %vm339_vm2, %v2437_v6 }
 0x691   :  { %1955 = vmatprep.mubr.msk.f32.mxu1 %vm2186_vm0, %v2187_v4  ;;  %2067 = vmatpush3.bf16.msra.mxu1 %v2066_v47 }
 0x692   :  { %2068 = vmatprep.subr.bf16.mxu1 %v2185_v3 }
 0x694   :  { %1956 = vmatmul.mubr.msk.f32.gmra.mrb[32].mxu1 %vm339_vm2, %v2439_v9 }
 0x695   :  { %1958 = vmatprep.mubr.msk.f32.mxu1 %vm2186_vm0, %v2187_v4  ;;  %2070 = vmatpush3.bf16.msra.mxu1 %v2069_v49 }
 0x696   :  { %2071 = vmatprep.subr.bf16.mxu1 %v2185_v3 }
 0x698   :  { %1959 = vmatmul.mubr.msk.f32.gmra.mrb[34].mxu1 %vm339_vm2, %v2441_v14 }
 0x699   :  { %1994 = vmatprep.mubr.msk.f32.mxu1 %vm2186_vm0, %v2187_v4 }
 0x757   :  { %v1067_v50 = vpop.f32.mrb[24].mxu1 }
 0x758   :  { %v1928_v6 = vpop.f32.mrb[25].mxu1  ;;  %1940 = vmatmul.mubr.msk.f32.vlgmr.msra.gmra.mrb[30].mxu0 %vm339_vm2, %v1067_v50  ;;  %v1457_v50 = vld [vmem:[%s2644_s5 + $0x20] sm:$0xff] }
 0x759   :  { %1942 = vmatprep.mubr.msk.f32.mxu0 %vm2186_vm0, %v2187_v4  ;;  %2061 = vmatpush3.bf16.msra.mxu0 %v2060_v37  ;;  %v1458_v6 = vld [vmem:[%s2644_s5 + $0x28] sm:$0xff] }
 0x75a   :  { %2062 = vmatprep.subr.bf16.mxu0 %v2185_v3 }
 0x75b   :  { %v1072_v51 = vpop.f32.mrb[26].mxu1 }
 0x75c   :  { %v1931_v53 = vpop.f32.mrb[27].mxu1  ;;  %1943 = vmatmul.mubr.msk.f32.gmra.mrb[32].mxu0 %vm339_vm2, %v1072_v51  ;;  %v2072_v51 = vpack.c.bf16 %v1458_v6, %v1457_v50 }
 0x75d   :  { %1945 = vmatprep.mubr.msk.f32.mxu0 %vm2186_vm0, %v2187_v4  ;;  %2064 = vmatpush3.bf16.msra.mxu0 %v2063_v30 }
 0x75e   :  { %2073 = vmatpush3.bf16.msra.mxu1 %v2072_v51 }
 0x75f   :  { %v1077_v9 = vpop.f32.mrb[28].mxu1  ;;  %2074 = vmatprep.subr.bf16.mxu1 %v2185_v3 }
 0x760   :  { %v1934_v54 = vpop.f32.mrb[29].mxu1  ;;  %1946 = vmatmul.mubr.msk.f32.gmra.mrb[34].mxu0 %vm339_vm2, %v1077_v9 }
 0x761   :  { %1969 = vmatprep.mubr.msk.f32.mxu0 %vm2186_vm0, %v2187_v4 }
 0x763   :  { %v1257_v14 = vpop.f32.mrb[30].mxu1 }
 0x764   :  { %v1954_v39 = vpop.f32.mrb[31].mxu1 }
 0x767   :  { %v1262_v55 = vpop.f32.mrb[32].mxu1 }
 0x768   :  { %v1957_v29 = vpop.f32.mrb[33].mxu1 }
 0x76b   :  { %v1267_v56 = vpop.f32.mrb[34].mxu1 }
 0x76c   :  { %v1960_v58 = vpop.f32.mrb[35].mxu1 }
 0x82b   :  { %v1162_v60 = vpop.f32.mrb[30].mxu0 }
 0x82c   :  { %v1258_v61 = vadd.f32 %v1257_v14, %v1162_v60  ;;  %v1941_v62 = vpop.f32.mrb[31].mxu0 }
 0x82e   :  { %v1275_v52 = vadd.f32 %v1666_v59, %v1258_v61 }
 0x82f   :  { %v1167_v0 = vpop.f32.mrb[32].mxu0 }
 0x830   :  { %v1263_v1 = vadd.f32 %v1262_v55, %v1167_v0  ;;  %v1944_v2 = vpop.f32.mrb[33].mxu0  ;;  %v1278_v8 = vadd.f32 %v1275_v52, %v2264_v10 }
 0x832   :  { %v1276_v13 = vadd.f32 %v1666_v59, %v1263_v1  ;;  %v1281_v15 = vsel %vm53_vm1, %v1278_v8, 0.0 }
 0x833   :  { %1282 = vadd.xlane.f32.xlu1 %v1281_v15  ;;  %v1172_v57 = vpop.f32.mrb[34].mxu0 }
 0x834   :  { %v1268_v16 = vadd.f32 %v1267_v56, %v1172_v57  ;;  %v1947_v17 = vpop.f32.mrb[35].mxu0  ;;  %v1279_v18 = vadd.f32 %v1276_v13, %v2273_v11  ;;  %v1667_v56 = vld [vmem:[%s2640_s6 + $0x4] ss:$0 sm:$0xff] }
 0x836   :  { %v1277_v63 = vadd.f32 %v1666_v59, %v1268_v16  ;;  %v1284_v19 = vsel %vm53_vm1, %v1279_v18, 0.0  ;;  %v1668_v59 = vld [vmem:[%s2640_s6 + $0x5] ss:$0 sm:$0xff] }
 0x837   :  { %1285 = vadd.xlane.f32.xlu0 %v1284_v19 }
 0x838   :  { %v1280_v20 = vadd.f32 %v1277_v63, %v2282_v12  ;;  %v33_v12 = vld [vmem:[%s2642_s2 + $0x8] sm:$0xff] }
 0x83a   :  { %v1287_v21 = vsel %vm53_vm1, %v1280_v20, 0.0 }
 0x83b   :  { %1288 = vadd.xlane.f32.xlu0 %v1287_v21 }
 0x8c0   :  { %v1283_v10 = vpop.xlane.xlu1 %1282 }
 0x8c1   :  { %v1291_v23 = vmul.f32 0.03125, %v1283_v10  ;;  %v1460_v10 = vld [vmem:[%s2644_s5 + $0x38] sm:$0xff] }
 0x8c3   :  { %v1294_v24 = vsub.f32 %v1278_v8, %v1291_v23  ;;  %v2075_v23 = vpack.c.bf16 %v1460_v10, %v1459_v22 }
 0x8c4   :  { %v1286_v25 = vpop.xlane.xlu0 %1285 }
 0x8c5   :  { %v1292_v26 = vmul.f32 0.03125, %v1286_v25  ;;  %v1297_v27 = vmul.f32 %v1294_v24, %v1294_v24  ;;  %2076 = vmatpush3.bf16.msra.mxu1 %v2075_v23 }
 0x8c7   :  { %v1295_v28 = vsub.f32 %v1279_v18, %v1292_v26  ;;  %v1300_v11 = vsel %vm53_vm1, %v1297_v27, 0.0 }
 0x8c8   :  { %1301 = vadd.xlane.f32.xlu1 %v1300_v11  ;;  %v1289_v40 = vpop.xlane.xlu0 %1288 }
 0x8c9   :  { %v1298_v31 = vmul.f32 %v1295_v28, %v1295_v28  ;;  %v1293_v5 = vmul.f32 0.03125, %v1289_v40 }
 0x8cb   :  { %v1303_v32 = vsel %vm53_vm1, %v1298_v31, 0.0  ;;  %v1296_v41 = vsub.f32 %v1280_v20, %v1293_v5 }
 0x8cc   :  { %1304 = vadd.xlane.f32.xlu0 %v1303_v32 }
 0x8cd   :  { %v1299_v7 = vmul.f32 %v1296_v41, %v1296_v41 }
 0x8cf   :  { %v1306_v42 = vsel %vm53_vm1, %v1299_v7, 0.0 }
 0x8d9   :  { %1342 = vperm.xlu1 %2148, %v33_v12  }
 0x8e2   :  { %1337 = vperm.xlu0 %2147, %v32_v33  }
 0x8fd   :  { %1307 = vadd.xlane.f32.xlu1 %v1306_v42 }
 0x90e   :  { %1347 = vperm.xlu1 %2148, %v34_v43  }
 0x955   :  { %v1302_v53 = vpop.xlane.xlu1 %1301 }
 0x956   :  { %v1309_v9 = vmul.f32 0.03125, %v1302_v53 }
 0x958   :  { %v1312_v54 = vadd.f32 1e-05, %v1309_v9 }
 0x959   :  { %v1305_v14 = vpop.xlane.xlu0 %1304  ;;  %v2583_v8 = vpop.permute.xlu1 %1342 }
 0x95a   :  { %2173 = vrsqrt.f32 %v1312_v54  ;;  %v1310_v39 = vmul.f32 0.03125, %v1305_v14 }
 0x95c   :  { %v1313_v55 = vadd.f32 1e-05, %v1310_v39 }
 0x95e   :  { %2175 = vrsqrt.f32 %v1313_v55 }
 0x961   :  { %v2579_v61 = vpop.permute.xlu0 %1337 }
 0x964   :  { %v2174_v29 = vpop.eup %2173 }
 0x965   :  { %v1318_v58 = vmul.f32 %v2174_v29, %v1294_v24  ;;  %v1669_v24 = vld [vmem:[%s2640_s6 + $0x6] ss:$0 sm:$0xff] }
 0x967   :  { %v1325_v60 = vmul.f32 %v1667_v56, %v1318_v58 }
 0x968   :  { %v2176_v3 = vpop.eup %2175 }
 0x969   :  { %v1319_v62 = vmul.f32 %v2176_v3, %v1295_v28  ;;  %v1332_v52 = vadd.f32 %v1668_v59, %v1325_v60 }
 0x96b   :  { %v1326_v0 = vmul.f32 %v1667_v56, %v1319_v62  ;;  %v1350_v1 = vmul.f32 %v2579_v61, %v1332_v52 }
 0x96d   :  { %v1333_v2 = vadd.f32 %v1668_v59, %v1326_v0  ;;  %1970 = vmatmul.mubr.msk.f32.vlgmr.msra.gmra.mrb[36].mxu0 %vm53_vm1, %v1350_v1 }
 0x96e   :  { %1972 = vmatprep.mubr.msk.f32.mxu0 %vm2186_vm0, %v2187_v4 }
 0x96f   :  { %v1351_v13 = vmul.f32 %v2583_v8, %v1333_v2 }
 0x971   :  { %1973 = vmatmul.mubr.msk.f32.gmra.mrb[38].mxu0 %vm53_vm1, %v1351_v13 }
 0x972   :  { %1975 = vmatprep.mubr.msk.f32.mxu0 %vm2186_vm0, %v2187_v4 }
 0x98a   :  { %v1308_v15 = vpop.xlane.xlu1 %1307 }
 0x98b   :  { %v1311_v57 = vmul.f32 0.03125, %v1308_v15 }
 0x98d   :  { %v1314_v16 = vadd.f32 1e-05, %v1311_v57  ;;  %v1677_v57 = vld [vmem:[%s2640_s6 + $0x8] ss:$0 sm:$0xff] }
 0x98e   :  { %v2591_v20 = vpop.permute.xlu1 %1347 }
 0x98f   :  { %2177 = vrsqrt.f32 %v1314_v16 }
 0x999   :  { %v2178_v17 = vpop.eup %2177 }
 0x99a   :  { %v1320_v18 = vmul.f32 %v2178_v17, %v1296_v41  ;;  %v1678_v17 = vld [vmem:[%s2640_s6 + $0x9] ss:$0 sm:$0xff] }
 0x99c   :  { %v1327_v63 = vmul.f32 %v1667_v56, %v1320_v18 }
 0x99e   :  { %v1334_v19 = vadd.f32 %v1668_v59, %v1327_v63 }
 0x9a0   :  { %v1352_v21 = vmul.f32 %v2591_v20, %v1334_v19 }
 0x9a2   :  { %1976 = vmatmul.mubr.msk.f32.gmra.mrb[40].mxu0 %vm53_vm1, %v1352_v21 }
 0xa40   :  { %v1436_v25 = vpop.f32.mrb[36].mxu0 }
 0xa41   :  { %v1437_v26 = vadd.f32 %v1669_v24, %v1436_v25  ;;  %v1971_v27 = vpop.f32.mrb[37].mxu0 }
 0xa43   :  { %v1450_v28 = vmax.f32 %v1437_v26, 0.0 }
 0xa44   :  { %v1441_v11 = vpop.f32.mrb[38].mxu0 }
 0xa45   :  { %v1442_v31 = vadd.f32 %v1669_v24, %v1441_v11  ;;  %v1974_v32 = vpop.f32.mrb[39].mxu0  ;;  %1995 = vmatmul.mubr.msk.f32.vlgmr.msra.gmra.mrb[36].mxu1 %vm1465_vm5, %v1450_v28 }
 0xa46   :  { %1997 = vmatprep.mubr.msk.f32.mxu1 %vm2186_vm0, %v2187_v4 }
 0xa47   :  { %v1451_v12 = vmax.f32 %v1442_v31, 0.0 }
 0xa49   :  { %1998 = vmatmul.mubr.msk.f32.gmra.mrb[38].mxu1 %vm1465_vm5, %v1451_v12 }
 0xa4a   :  { %2000 = vmatprep.mubr.msk.f32.mxu1 %vm2186_vm0, %v2187_v4 }
 0xa75   :  { %v1446_v33 = vpop.f32.mrb[40].mxu0 }
 0xa76   :  { %v1447_v35 = vadd.f32 %v1669_v24, %v1446_v33  ;;  %v1977_v36 = vpop.f32.mrb[41].mxu0 }
 0xa78   :  { %v1452_v37 = vmax.f32 %v1447_v35, 0.0 }
 0xa7a   :  { %2001 = vmatmul.mubr.msk.f32.gmra.mrb[40].mxu1 %vm1465_vm5, %v1452_v37 }
 0xb18   :  { %v1541_v34 = vpop.f32.mrb[36].mxu1 }
 0xb19   :  { %v1542_v30 = vadd.f32 %v1673_v38, %v1541_v34  ;;  %v1996_v40 = vpop.f32.mrb[37].mxu1 }
 0xb1b   :  { %v1555_v5 = vadd.f32 %v1542_v30, %v1350_v1 }
 0xb1c   :  { %v1546_v41 = vpop.f32.mrb[38].mxu1 }
 0xb1d   :  { %v1547_v7 = vadd.f32 %v1673_v38, %v1546_v41  ;;  %v1999_v42 = vpop.f32.mrb[39].mxu1  ;;  %v1558_v43 = vsel %vm53_vm1, %v1555_v5, 0.0 }
 0xb1e   :  { %1559 = vadd.xlane.f32.xlu1 %v1558_v43 }
 0xb1f   :  { %v1556_v4 = vadd.f32 %v1547_v7, %v1351_v13 }
 0xb21   :  { %v1561_v44 = vsel %vm53_vm1, %v1556_v4, 0.0 }
 0xb22   :  { %1562 = vadd.xlane.f32.xlu0 %v1561_v44 }
 0xb4d   :  { %v1551_v45 = vpop.f32.mrb[40].mxu1 }
 0xb4e   :  { %v1552_v46 = vadd.f32 %v1673_v38, %v1551_v45  ;;  %v2002_v47 = vpop.f32.mrb[41].mxu1 }
 0xb50   :  { %v1557_v48 = vadd.f32 %v1552_v46, %v1352_v21 }
 0xb52   :  { %v1564_v49 = vsel %vm53_vm1, %v1557_v48, 0.0 }
 0xb53   :  { %1565 = vadd.xlane.f32.xlu1 %v1564_v49 }
 0xbab   :  { %v1560_v50 = vpop.xlane.xlu1 %1559 }
 0xbac   :  { %v1567_v6 = vmul.f32 0.03125, %v1560_v50 }
 0xbae   :  { %v1570_v51 = vsub.f32 %v1555_v5, %v1567_v6 }
 0xbaf   :  { %v1563_v53 = vpop.xlane.xlu0 %1562 }
 0xbb0   :  { %v1568_v9 = vmul.f32 0.03125, %v1563_v53  ;;  %v1573_v54 = vmul.f32 %v1570_v51, %v1570_v51 }
 0xbb2   :  { %v1571_v14 = vsub.f32 %v1556_v4, %v1568_v9  ;;  %v1576_v39 = vsel %vm53_vm1, %v1573_v54, 0.0 }
 0xbb3   :  { %1577 = vadd.xlane.f32.xlu1 %v1576_v39 }
 0xbb4   :  { %v1574_v55 = vmul.f32 %v1571_v14, %v1571_v14 }
 0xbb6   :  { %v1579_v29 = vsel %vm53_vm1, %v1574_v55, 0.0 }
 0xbb7   :  { %1580 = vadd.xlane.f32.xlu1 %v1579_v29 }
 0xbe0   :  { %v1566_v56 = vpop.xlane.xlu1 %1565 }
 0xbe1   :  { %v1569_v58 = vmul.f32 0.03125, %v1566_v56 }
 0xbe3   :  { %v1572_v59 = vsub.f32 %v1557_v48, %v1569_v58 }
 0xbe5   :  { %v1575_v60 = vmul.f32 %v1572_v59, %v1572_v59 }
 0xbe7   :  { %v1582_v3 = vsel %vm53_vm1, %v1575_v60, 0.0 }
 0xbe8   :  { %1583 = vadd.xlane.f32.xlu1 %v1582_v3 }
 0xc40   :  { %v1578_v62 = vpop.xlane.xlu1 %1577 }
 0xc41   :  { %v1585_v52 = vmul.f32 0.03125, %v1578_v62 }
 0xc43   :  { %v1588_v0 = vadd.f32 1e-05, %v1585_v52 }
 0xc44   :  { %v1581_v1 = vpop.xlane.xlu1 %1580 }
 0xc45   :  { %2179 = vrsqrt.f32 %v1588_v0  ;;  %v1586_v2 = vmul.f32 0.03125, %v1581_v1 }
 0xc47   :  { %v1589_v13 = vadd.f32 1e-05, %v1586_v2 }
 0xc49   :  { %2181 = vrsqrt.f32 %v1589_v13 }
 0xc4f   :  { %v2180_v15 = vpop.eup %2179 }
 0xc50   :  { %v1594_v16 = vmul.f32 %v2180_v15, %v1570_v51 }
 0xc52   :  { %v1601_v18 = vmul.f32 %v1677_v57, %v1594_v16 }
 0xc53   :  { %v2182_v63 = vpop.eup %2181 }
 0xc54   :  { %v1608_v19 = vadd.f32 %v1678_v17, %v1601_v18  ;;  %v1595_v21 = vmul.f32 %v2182_v63, %v1571_v14 }
 0xc56   :  { %v1611_v22 = vmul.f32 %v1608_v19, %v2579_v61  ;;  %v1602_v10 = vmul.f32 %v1677_v57, %v1595_v21 }
 0xc58   :  { %1614 = vst.msk [vmem:[%s2645_s7] sm:$0xff] %vm53_vm1, %v1611_v22  ;;  %v1609_v23 = vadd.f32 %v1678_v17, %v1602_v10 }
 0xc5a   :  { %v1612_v24 = vmul.f32 %v1609_v23, %v2583_v8 }
 0xc5c   :  { %1615 = vst.msk [vmem:[%s2645_s7 + $0x8] sm:$0xff] %vm53_vm1, %v1612_v24 }
 0xc75   :  { %v1584_v25 = vpop.xlane.xlu1 %1583 }
 0xc76   :  { %v1587_v26 = vmul.f32 0.03125, %v1584_v25 }
 0xc78   :  { %v1590_v27 = vadd.f32 1e-05, %v1587_v26 }
 0xc7a   :  { %2183 = vrsqrt.f32 %v1590_v27 }
 0xc84   :  { %v2184_v28 = vpop.eup %2183 }
 0xc85   :  { %v1596_v61 = vmul.f32 %v2184_v28, %v1572_v59 }
 0xc87   :  { %v1603_v11 = vmul.f32 %v1677_v57, %v1596_v61 }
 0xc89   :  { %v1610_v31 = vadd.f32 %v1678_v17, %v1603_v11 }
 0xc8b   :  { %v1613_v32 = vmul.f32 %v1610_v31, %v2591_v20 }
 0xc8d   :  { %1616 = vst.msk [vmem:[%s2645_s7 + $0x10] sm:$0xff] %vm53_vm1, %v1613_v32 }

</bundles_post_ra>
